<compile_context>
chip_gen: v5e
topology: v5e:2x2
jax: 0.10.0
libtpu: 0.0.40
codegen_flags: <defaults>
</compile_context>

<pallas_src>
import functools

import jax
import jax.numpy as jnp
from jax import lax
from jax.experimental import pallas as pl
from jax.experimental.pallas import tpu as pltpu


# ---------------------------------------------------------------------------
# Helpers
# ---------------------------------------------------------------------------

def _round_up(x, m):
    return (x + m - 1) // m * m


def _pick_tile(dim, target, align):
    """Largest tile <= target that divides `dim` and is a multiple of `align`,
    falling back to the full dimension (always a legal Mosaic block)."""
    if dim <= target:
        return dim
    t = (target // align) * align
    while t >= align:
        if dim % t == 0:
            return t
        t -= align
    return dim


def _vmem_limit_bytes():
    """Generation-aware scoped-VMEM limit (~70% of physical, capped)."""
    try:
        cap = pltpu.get_tpu_info().vmem_capacity_bytes
        return min(int(cap * 0.7), 100 * 1024 * 1024)
    except Exception:
        return 32 * 1024 * 1024  # conservative fallback (safe on v7x)


# ---------------------------------------------------------------------------
# Tiled linear projection kernels (X @ W [+ b])
# ---------------------------------------------------------------------------

def _matmul_kernel(x_ref, w_ref, o_ref):
    o_ref[...] = jnp.dot(x_ref[...], w_ref[...],
                         preferred_element_type=jnp.float32).astype(o_ref.dtype)


def _matmul_bias_kernel(x_ref, w_ref, b_ref, o_ref):
    acc = jnp.dot(x_ref[...], w_ref[...], preferred_element_type=jnp.float32)
    o_ref[...] = (acc + b_ref[...].astype(jnp.float32)).astype(o_ref.dtype)


def _matmul_acc_kernel(x_ref, w_ref, o_ref, acc_ref):
    @pl.when(pl.program_id(2) == 0)
    def _():
        acc_ref[...] = jnp.zeros_like(acc_ref)

    acc_ref[...] += jnp.dot(x_ref[...], w_ref[...],
                            preferred_element_type=jnp.float32)

    @pl.when(pl.program_id(2) == pl.num_programs(2) - 1)
    def _():
        o_ref[...] = acc_ref[...].astype(o_ref.dtype)


def _matmul_acc_bias_kernel(x_ref, w_ref, b_ref, o_ref, acc_ref):
    @pl.when(pl.program_id(2) == 0)
    def _():
        acc_ref[...] = jnp.zeros_like(acc_ref)

    acc_ref[...] += jnp.dot(x_ref[...], w_ref[...],
                            preferred_element_type=jnp.float32)

    @pl.when(pl.program_id(2) == pl.num_programs(2) - 1)
    def _():
        o_ref[...] = (acc_ref[...] + b_ref[...].astype(jnp.float32)).astype(o_ref.dtype)


def pallas_linear(x, w, b=None, *, tm_target=512, tn_target=512, tk_target=512,
                  k_fuse_limit=2048):
    """Tiled (M,K)@(K,N)[+b] with fp32 accumulation on the MXU.

    For ViT-sized K (<= k_fuse_limit) the whole reduction is done per tile:
    no reduction grid axis, no accumulator scratch, single lane-dense output
    store per (i, j) tile.
    """
    M, K = x.shape
    Kw, N = w.shape
    assert K == Kw
    sub = 16 if x.dtype == jnp.bfloat16 else 8

    tm = min(tm_target, _round_up(M, sub))
    m_pad = _round_up(M, tm)
    if m_pad != M:
        x = jnp.pad(x, ((0, m_pad - M), (0, 0)))
    tn = _pick_tile(N, tn_target, 128)

    vmem_limit = _vmem_limit_bytes()
    cost = pl.CostEstimate(
        flops=2 * M * N * K,
        transcendentals=0,
        bytes_accessed=(M * K + K * N + M * N) * x.dtype.itemsize,
    )

    if K <= k_fuse_limit:
        grid = (m_pad // tm, N // tn)
        in_specs = [pl.BlockSpec((tm, K), lambda i, j: (i, 0)),
                    pl.BlockSpec((K, tn), lambda i, j: (0, j))]
        operands = [x, w]
        kernel = _matmul_kernel
        if b is not None:
            in_specs.append(pl.BlockSpec((1, tn), lambda i, j: (0, j)))
            operands.append(b.reshape(1, N))
            kernel = _matmul_bias_kernel
        out = pl.pallas_call(
            kernel,
            out_shape=jax.ShapeDtypeStruct((m_pad, N), x.dtype),
            grid=grid,
            in_specs=in_specs,
            out_specs=pl.BlockSpec((tm, tn), lambda i, j: (i, j)),
            compiler_params=pltpu.CompilerParams(
                dimension_semantics=("parallel", "parallel"),
                vmem_limit_bytes=vmem_limit,
            ),
            cost_estimate=cost,
        )(*operands)
    else:
        tk = _pick_tile(K, tk_target, 128)
        grid = (m_pad // tm, N // tn, K // tk)
        in_specs = [pl.BlockSpec((tm, tk), lambda i, j, k: (i, k)),
                    pl.BlockSpec((tk, tn), lambda i, j, k: (k, j))]
        operands = [x, w]
        kernel = _matmul_acc_kernel
        if b is not None:
            in_specs.append(pl.BlockSpec((1, tn), lambda i, j, k: (0, j)))
            operands.append(b.reshape(1, N))
            kernel = _matmul_acc_bias_kernel
        out = pl.pallas_call(
            kernel,
            out_shape=jax.ShapeDtypeStruct((m_pad, N), x.dtype),
            grid=grid,
            in_specs=in_specs,
            out_specs=pl.BlockSpec((tm, tn), lambda i, j, k: (i, j)),
            scratch_shapes=[pltpu.VMEM((tm, tn), jnp.float32)],
            compiler_params=pltpu.CompilerParams(
                dimension_semantics=("parallel", "parallel", "arbitrary"),
                vmem_limit_bytes=vmem_limit,
            ),
            cost_estimate=cost,
        )(*operands)

    if m_pad != M:
        out = out[:M]
    return out


# ---------------------------------------------------------------------------
# Flash-style multi-head attention kernel (head-major, head on the grid)
# ---------------------------------------------------------------------------

def _flash_attn_kernel(q_ref, k_ref, v_ref, o_ref, qs_ref, m_ref, l_ref, acc_ref,
                       *, scale, kv_len, masked):
    # q_ref/o_ref: (1, tq, D); k_ref/v_ref: (1, tkv, D)
    # qs_ref: (tq, D) q*scale (caller dtype); m/l: (tq, 1) f32; acc: (tq, D) f32
    ki = pl.program_id(2)

    @pl.when(ki == 0)
    def _():
        # scale hoisted: applied once per q tile, not per kv step.
        qs_ref[...] = (q_ref[0, :, :].astype(jnp.float32) * scale).astype(qs_ref.dtype)
        m_ref[...] = jnp.full(m_ref.shape, -jnp.inf, dtype=jnp.float32)
        l_ref[...] = jnp.zeros_like(l_ref)
        acc_ref[...] = jnp.zeros_like(acc_ref)

    # scores: contract on the head dim of BOTH operands (no explicit K^T),
    # f32 accumulate on the MXU.
    s = lax.dot_general(qs_ref[...], k_ref[0, :, :], (((1,), (1,)), ((), ())),
                        preferred_element_type=jnp.float32)          # (tq, tkv)
    if masked:
        tkv = k_ref.shape[1]
        kv_pos = ki * tkv + lax.broadcasted_iota(jnp.int32, s.shape, 1)
        s = jnp.where(kv_pos < kv_len, s, -jnp.inf)

    m_prev = m_ref[...]
    m_new = jnp.maximum(m_prev, jnp.max(s, axis=-1, keepdims=True))
    alpha = jnp.exp(m_prev - m_new)
    p = jnp.exp(s - m_new)                                            # (tq, tkv) f32

    l_ref[...] = alpha * l_ref[...] + jnp.sum(p, axis=-1, keepdims=True)
    acc_ref[...] = alpha * acc_ref[...] + jnp.dot(
        p.astype(v_ref.dtype), v_ref[0, :, :], preferred_element_type=jnp.float32)
    m_ref[...] = m_new

    @pl.when(ki == pl.num_programs(2) - 1)
    def _():
        # Exact divide: runs once per q tile, negligible cost, full f32 accuracy.
        o_ref[0, :, :] = (acc_ref[...] / l_ref[...]).astype(o_ref.dtype)


def pallas_flash_mhsa(q, k, v, scale, *, t_target=256):
    """q, k, v: (B*H, N, D) head-major. Returns (B*H, N, D) attention output."""
    BH, N, D = q.shape
    sub = 16 if q.dtype == jnp.bfloat16 else 8
    t = t_target if N >= t_target else _round_up(N, sub)
    n_pad = _round_up(N, t)
    masked = n_pad != N
    if masked:
        pad = ((0, 0), (0, n_pad - N), (0, 0))
        q = jnp.pad(q, pad)
        k = jnp.pad(k, pad)
        v = jnp.pad(v, pad)

    grid = (BH, n_pad // t, n_pad // t)
    kern = functools.partial(_flash_attn_kernel, scale=scale, kv_len=N, masked=masked)

    itemsize = q.dtype.itemsize
    cost = pl.CostEstimate(
        flops=4 * BH * n_pad * n_pad * D,
        transcendentals=BH * n_pad * n_pad,
        bytes_accessed=(BH * (n_pad // t) * n_pad * 2 * D      # K/V re-reads
                        + 2 * BH * n_pad * D) * itemsize,      # Q + output
    )

    out = pl.pallas_call(
        kern,
        out_shape=jax.ShapeDtypeStruct((BH, n_pad, D), q.dtype),
        grid=grid,
        in_specs=[
            pl.BlockSpec((1, t, D), lambda bh, qi, ki: (bh, qi, 0)),
            pl.BlockSpec((1, t, D), lambda bh, qi, ki: (bh, ki, 0)),
            pl.BlockSpec((1, t, D), lambda bh, qi, ki: (bh, ki, 0)),
        ],
        out_specs=pl.BlockSpec((1, t, D), lambda bh, qi, ki: (bh, qi, 0)),
        scratch_shapes=[
            pltpu.VMEM((t, D), q.dtype),       # q * scale (written at ki==0)
            pltpu.VMEM((t, 1), jnp.float32),   # running max
            pltpu.VMEM((t, 1), jnp.float32),   # running sum
            pltpu.VMEM((t, D), jnp.float32),   # output accumulator
        ],
        compiler_params=pltpu.CompilerParams(
            dimension_semantics=("parallel", "parallel", "arbitrary"),
            vmem_limit_bytes=_vmem_limit_bytes(),
        ),
        cost_estimate=cost,
    )(q, k, v)

    if masked:
        out = out[:, :N, :]
    return out


# ---------------------------------------------------------------------------
# Forward pass (eval mode)
# ---------------------------------------------------------------------------

def attention_forward(x, params, num_heads):
    B, N, C = x.shape
    D = C // num_heads
    scale = float(D) ** -0.5

    # fused qkv projection (qkv_bias=False)
    qkv = pallas_linear(x.reshape(B * N, C), params["w_qkv"])          # (B*N, 3C)

    # split into head-major q/k/v exactly like the PyTorch permute:
    # (B, N, 3, H, D) -> (3, B, H, N, D) -> three (B*H, N, D) arrays
    qkv = qkv.reshape(B, N, 3, num_heads, D).transpose(2, 0, 3, 1, 4)
    q = qkv[0].reshape(B * num_heads, N, D)
    k = qkv[1].reshape(B * num_heads, N, D)
    v = qkv[2].reshape(B * num_heads, N, D)

    # q_norm / k_norm are Identity (qk_norm=False); attn_drop p=0 -> no-op
    o = pallas_flash_mhsa(q, k, v, scale)                              # (B*H, N, D)

    # merge heads (x.transpose(1,2).reshape(B,N,C)) and project; proj_drop p=0
    o = o.reshape(B, num_heads, N, D).transpose(0, 2, 1, 3).reshape(B * N, C)
    out = pallas_linear(o, params["w_proj"], params["b_proj"])
    return out.reshape(B, N, C)


# ---------------------------------------------------------------------------
# Pure-JAX reference (correctness check)
# ---------------------------------------------------------------------------

def attention_reference(x, params, num_heads):
    B, N, C = x.shape
    D = C // num_heads
    scale = D ** -0.5
    qkv = x.reshape(B * N, C) @ params["w_qkv"]
    qkv = qkv.reshape(B, N, 3, num_heads, D).transpose(2, 0, 3, 1, 4)
    q, k, v = qkv[0], qkv[1], qkv[2]
    attn = jax.nn.softmax((q * scale) @ jnp.swapaxes(k, -2, -1), axis=-1)
    o = (attn @ v).transpose(0, 2, 1, 3).reshape(B * N, C)
    return (o @ params["w_proj"] + params["b_proj"]).reshape(B, N, C)


# ---------------------------------------------------------------------------
# Main
# ---------------------------------------------------------------------------

if __name__ == "__main__":
    B, N, C = 2, 8, 32
    num_heads = 8

    key = jax.random.PRNGKey(0)
    kx, kqkv, kproj, kb = jax.random.split(key, 4)

    x = jax.random.normal(kx, (B, N, C), dtype=jnp.float32)
    params = {
        "w_qkv": jax.random.normal(kqkv, (C, 3 * C), dtype=jnp.float32) * (C ** -0.5),
        "w_proj": jax.random.normal(kproj, (C, C), dtype=jnp.float32) * (C ** -0.5),
        "b_proj": jax.random.normal(kb, (C,), dtype=jnp.float32) * 0.02,
    }

    fwd = jax.jit(functools.partial(attention_forward, num_heads=num_heads))
    out = jax.block_until_ready(fwd(x, params))

    ref = attention_reference(x, params, num_heads)
    assert out.shape == (B, N, C)
    assert jnp.allclose(out, ref, atol=2e-3, rtol=2e-3), (
        f"mismatch vs reference, max abs err={float(jnp.max(jnp.abs(out - ref))):.3e}")

    print("KERNEL_OK")
</pallas_src>

<mosaic_0001>
module attributes {stable_mosaic.version = 11 : i64} {
  func.func @_matmul_kernel(%arg0: i32, %arg1: i32, %arg2: memref<16x32xf32, #tpu.memory_space<vmem>>, %arg3: memref<32x96xf32, #tpu.memory_space<vmem>>, %arg4: memref<16x96xf32, #tpu.memory_space<vmem>>) attributes {dimension_semantics = [#tpu.dimension_semantics<parallel>, #tpu.dimension_semantics<parallel>], iteration_bounds = array<i64: 1, 1>, scalar_prefetch = 0 : i64, scratch_operands = 0 : i64, tpu.core_type = #tpu.core_type<tc>, window_params = [{transform_indices = @transform_0, window_bounds = array<i64: 16, 32>}, {transform_indices = @transform_1, window_bounds = array<i64: 32, 96>}, {transform_indices = @transform_2, window_bounds = array<i64: 16, 96>}]} {
    %c0 = arith.constant 0 : index
    %c0_0 = arith.constant 0 : index
    %0 = vector.load %arg2[%c0, %c0_0] : memref<16x32xf32, #tpu.memory_space<vmem>>, vector<16x32xf32>
    %c0_1 = arith.constant 0 : index
    %c0_2 = arith.constant 0 : index
    %1 = vector.load %arg3[%c0_1, %c0_2] : memref<32x96xf32, #tpu.memory_space<vmem>>, vector<32x96xf32>
    %cst = arith.constant dense<0.000000e+00> : vector<16x96xf32>
    %2 = tpu.matmul %0, %1, %cst {dimension_numbers = #tpu.dot_dimension_numbers<[1], [0], [0], [1], [0, 0, 1, 1], [], []>} : vector<16x32xf32>, vector<32x96xf32>, vector<16x96xf32> -> vector<16x96xf32>
    %c0_3 = arith.constant 0 : index
    %c0_4 = arith.constant 0 : index
    %3 = vector.load %arg4[%c0_3, %c0_4] : memref<16x96xf32, #tpu.memory_space<vmem>>, vector<16x96xf32>
    tpu.vector_store %arg4[%c0_3, %c0_4], %2 {strides = array<i32>} : memref<16x96xf32, #tpu.memory_space<vmem>>, vector<16x96xf32>,
    return
  }
  func.func @transform_0(%arg0: i32, %arg1: i32) -> (i32, i32) {
    %c0_i32 = arith.constant 0 : i32
    %c0_i32_0 = arith.constant 0 : i32
    return %arg0, %c0_i32 : i32, i32
  }
  func.func @transform_1(%arg0: i32, %arg1: i32) -> (i32, i32) {
    %c0_i32 = arith.constant 0 : i32
    %c0_i32_0 = arith.constant 0 : i32
    return %c0_i32, %arg1 : i32, i32
  }
  func.func @transform_2(%arg0: i32, %arg1: i32) -> (i32, i32) {
    %c0_i32 = arith.constant 0 : i32
    return %arg0, %arg1 : i32, i32
  }
}

module attributes {stable_mosaic.version = 11 : i64} {
  func.func @_flash_attn_kernel(%arg0: i32, %arg1: i32, %arg2: i32, %arg3: memref<1x8x4xf32, #tpu.memory_space<vmem>>, %arg4: memref<1x8x4xf32, #tpu.memory_space<vmem>>, %arg5: memref<1x8x4xf32, #tpu.memory_space<vmem>>, %arg6: memref<1x8x4xf32, #tpu.memory_space<vmem>>, %arg7: memref<8x4xf32, #tpu.memory_space<vmem>>, %arg8: memref<8x1xf32, #tpu.memory_space<vmem>>, %arg9: memref<8x1xf32, #tpu.memory_space<vmem>>, %arg10: memref<8x4xf32, #tpu.memory_space<vmem>>) attributes {dimension_semantics = [#tpu.dimension_semantics<parallel>, #tpu.dimension_semantics<parallel>, #tpu.dimension_semantics<arbitrary>], iteration_bounds = array<i64: 16, 1, 1>, scalar_prefetch = 0 : i64, scratch_operands = 4 : i64, tpu.core_type = #tpu.core_type<tc>, window_params = [{transform_indices = @transform_0, window_bounds = array<i64: 1, 8, 4>}, {transform_indices = @transform_1, window_bounds = array<i64: 1, 8, 4>}, {transform_indices = @transform_2, window_bounds = array<i64: 1, 8, 4>}, {transform_indices = @transform_3, window_bounds = array<i64: 1, 8, 4>}]} {
    %c0_i32 = arith.constant 0 : i32
    %0 = arith.cmpi eq, %arg2, %c0_i32 : i32
    %1 = arith.extui %0 : i1 to i32
    %c0_i32_0 = arith.constant 0 : i32
    %2 = arith.cmpi ne, %1, %c0_i32_0 : i32
    scf.if %2 {
      %c0_25 = arith.constant 0 : index
      %c0_26 = arith.constant 0 : index
      %c0_27 = arith.constant 0 : index
      %34 = vector.load %arg3[%c0_25, %c0_26, %c0_27] : memref<1x8x4xf32, #tpu.memory_space<vmem>>, vector<1x8x4xf32>
      %35 = vector.shape_cast %34 : vector<1x8x4xf32> to vector<8x4xf32>
      %cst_28 = arith.constant 5.000000e-01 : f32
      %36 = vector.broadcast %cst_28 : f32 to vector<8x4xf32>
      %37 = arith.mulf %35, %36 : vector<8x4xf32>
      %c0_29 = arith.constant 0 : index
      %c0_30 = arith.constant 0 : index
      %38 = vector.load %arg7[%c0_29, %c0_30] : memref<8x4xf32, #tpu.memory_space<vmem>>, vector<8x4xf32>
      tpu.vector_store %arg7[%c0_29, %c0_30], %37 {strides = array<i32>} : memref<8x4xf32, #tpu.memory_space<vmem>>, vector<8x4xf32>,
      %cst_31 = arith.constant 0xFF800000 : f32
      %39 = vector.broadcast %cst_31 : f32 to vector<8x1xf32>
      %c0_32 = arith.constant 0 : index
      %c0_33 = arith.constant 0 : index
      %40 = vector.load %arg8[%c0_32, %c0_33] : memref<8x1xf32, #tpu.memory_space<vmem>>, vector<8x1xf32>
      tpu.vector_store %arg8[%c0_32, %c0_33], %39 {strides = array<i32>} : memref<8x1xf32, #tpu.memory_space<vmem>>, vector<8x1xf32>,
      %cst_34 = arith.constant 0.000000e+00 : f32
      %41 = vector.broadcast %cst_34 : f32 to vector<8x1xf32>
      %c0_35 = arith.constant 0 : index
      %c0_36 = arith.constant 0 : index
      %42 = vector.load %arg9[%c0_35, %c0_36] : memref<8x1xf32, #tpu.memory_space<vmem>>, vector<8x1xf32>
      tpu.vector_store %arg9[%c0_35, %c0_36], %41 {strides = array<i32>} : memref<8x1xf32, #tpu.memory_space<vmem>>, vector<8x1xf32>,
      %cst_37 = arith.constant 0.000000e+00 : f32
      %43 = vector.broadcast %cst_37 : f32 to vector<8x4xf32>
      %c0_38 = arith.constant 0 : index
      %c0_39 = arith.constant 0 : index
      %44 = vector.load %arg10[%c0_38, %c0_39] : memref<8x4xf32, #tpu.memory_space<vmem>>, vector<8x4xf32>
      tpu.vector_store %arg10[%c0_38, %c0_39], %43 {strides = array<i32>} : memref<8x4xf32, #tpu.memory_space<vmem>>, vector<8x4xf32>,
    } else {
    }
    %c0 = arith.constant 0 : index
    %c0_1 = arith.constant 0 : index
    %3 = vector.load %arg7[%c0, %c0_1] : memref<8x4xf32, #tpu.memory_space<vmem>>, vector<8x4xf32>
    %c0_2 = arith.constant 0 : index
    %c0_3 = arith.constant 0 : index
    %c0_4 = arith.constant 0 : index
    %4 = vector.load %arg4[%c0_2, %c0_3, %c0_4] : memref<1x8x4xf32, #tpu.memory_space<vmem>>, vector<1x8x4xf32>
    %5 = vector.shape_cast %4 : vector<1x8x4xf32> to vector<8x4xf32>
    %cst = arith.constant dense<0.000000e+00> : vector<8x8xf32>
    %6 = tpu.matmul %3, %5, %cst {dimension_numbers = #tpu.dot_dimension_numbers<[1], [1], [0], [0], [0, 0, 1, 0], [], []>} : vector<8x4xf32>, vector<8x4xf32>, vector<8x8xf32> -> vector<8x8xf32>
    %c0_5 = arith.constant 0 : index
    %c0_6 = arith.constant 0 : index
    %7 = vector.load %arg8[%c0_5, %c0_6] : memref<8x1xf32, #tpu.memory_space<vmem>>, vector<8x1xf32>
    %cst_7 = arith.constant dense<0xFF800000> : vector<8xf32>
    %8 = vector.multi_reduction <maximumf>, %6, %cst_7 [1] : vector<8x8xf32> to vector<8xf32>
    %9 = vector.shape_cast %8 : vector<8xf32> to vector<8x1xf32>
    %10 = arith.maximumf %7, %9 : vector<8x1xf32>
    %11 = arith.subf %7, %10 : vector<8x1xf32>
    %12 = math.exp %11 : vector<8x1xf32>
    %13 = vector.broadcast %10 : vector<8x1xf32> to vector<8x8xf32>
    %14 = arith.subf %6, %13 : vector<8x8xf32>
    %15 = math.exp %14 : vector<8x8xf32>
    %c0_8 = arith.constant 0 : index
    %c0_9 = arith.constant 0 : index
    %16 = vector.load %arg9[%c0_8, %c0_9] : memref<8x1xf32, #tpu.memory_space<vmem>>, vector<8x1xf32>
    %17 = arith.mulf %12, %16 : vector<8x1xf32>
    %cst_10 = arith.constant dense<0.000000e+00> : vector<8xf32>
    %18 = vector.multi_reduction <add>, %15, %cst_10 [1] : vector<8x8xf32> to vector<8xf32>
    %19 = vector.shape_cast %18 : vector<8xf32> to vector<8x1xf32>
    %20 = arith.addf %17, %19 : vector<8x1xf32>
    %c0_11 = arith.constant 0 : index
    %c0_12 = arith.constant 0 : index
    %21 = vector.load %arg9[%c0_11, %c0_12] : memref<8x1xf32, #tpu.memory_space<vmem>>, vector<8x1xf32>
    tpu.vector_store %arg9[%c0_11, %c0_12], %20 {strides = array<i32>} : memref<8x1xf32, #tpu.memory_space<vmem>>, vector<8x1xf32>,
    %c0_13 = arith.constant 0 : index
    %c0_14 = arith.constant 0 : index
    %22 = vector.load %arg10[%c0_13, %c0_14] : memref<8x4xf32, #tpu.memory_space<vmem>>, vector<8x4xf32>
    %23 = vector.broadcast %12 : vector<8x1xf32> to vector<8x4xf32>
    %24 = arith.mulf %23, %22 : vector<8x4xf32>
    %c0_15 = arith.constant 0 : index
    %c0_16 = arith.constant 0 : index
    %c0_17 = arith.constant 0 : index
    %25 = vector.load %arg5[%c0_15, %c0_16, %c0_17] : memref<1x8x4xf32, #tpu.memory_space<vmem>>, vector<1x8x4xf32>
    %26 = vector.shape_cast %25 : vector<1x8x4xf32> to vector<8x4xf32>
    %cst_18 = arith.constant dense<0.000000e+00> : vector<8x4xf32>
    %27 = tpu.matmul %15, %26, %cst_18 {dimension_numbers = #tpu.dot_dimension_numbers<[1], [0], [0], [1], [0, 0, 1, 1], [], []>} : vector<8x8xf32>, vector<8x4xf32>, vector<8x4xf32> -> vector<8x4xf32>
    %28 = arith.addf %24, %27 : vector<8x4xf32>
    %c0_19 = arith.constant 0 : index
    %c0_20 = arith.constant 0 : index
    %29 = vector.load %arg10[%c0_19, %c0_20] : memref<8x4xf32, #tpu.memory_space<vmem>>, vector<8x4xf32>
    tpu.vector_store %arg10[%c0_19, %c0_20], %28 {strides = array<i32>} : memref<8x4xf32, #tpu.memory_space<vmem>>, vector<8x4xf32>,
    %c0_21 = arith.constant 0 : index
    %c0_22 = arith.constant 0 : index
    %30 = vector.load %arg8[%c0_21, %c0_22] : memref<8x1xf32, #tpu.memory_space<vmem>>, vector<8x1xf32>
    tpu.vector_store %arg8[%c0_21, %c0_22], %10 {strides = array<i32>} : memref<8x1xf32, #tpu.memory_space<vmem>>, vector<8x1xf32>,
    %c0_i32_23 = arith.constant 0 : i32
    %31 = arith.cmpi eq, %arg2, %c0_i32_23 : i32
    %32 = arith.extui %31 : i1 to i32
    %c0_i32_24 = arith.constant 0 : i32
    %33 = arith.cmpi ne, %32, %c0_i32_24 : i32
    scf.if %33 {
      %c0_25 = arith.constant 0 : index
      %c0_26 = arith.constant 0 : index
      %34 = vector.load %arg10[%c0_25, %c0_26] : memref<8x4xf32, #tpu.memory_space<vmem>>, vector<8x4xf32>
      %c0_27 = arith.constant 0 : index
      %c0_28 = arith.constant 0 : index
      %35 = vector.load %arg9[%c0_27, %c0_28] : memref<8x1xf32, #tpu.memory_space<vmem>>, vector<8x1xf32>
      %36 = vector.broadcast %35 : vector<8x1xf32> to vector<8x4xf32>
      %37 = arith.divf %34, %36 : vector<8x4xf32>
      %c0_29 = arith.constant 0 : index
      %c0_30 = arith.constant 0 : index
      %c0_31 = arith.constant 0 : index
      %38 = vector.load %arg6[%c0_29, %c0_30, %c0_31] : memref<1x8x4xf32, #tpu.memory_space<vmem>>, vector<1x8x4xf32>
      %39 = vector.shape_cast %38 : vector<1x8x4xf32> to vector<8x4xf32>
      %40 = vector.shape_cast %37 : vector<8x4xf32> to vector<1x8x4xf32>
      tpu.vector_store %arg6[%c0_29, %c0_30, %c0_31], %40 {strides = array<i32>} : memref<1x8x4xf32, #tpu.memory_space<vmem>>, vector<1x8x4xf32>,
    } else {
    }
    return
  }
  func.func @transform_0(%arg0: i32, %arg1: i32, %arg2: i32) -> (i32, i32, i32) {
    %c0_i32 = arith.constant 0 : i32
    %c0_i32_0 = arith.constant 0 : i32
    return %arg0, %arg1, %c0_i32 : i32, i32, i32
  }
  func.func @transform_1(%arg0: i32, %arg1: i32, %arg2: i32) -> (i32, i32, i32) {
    %c0_i32 = arith.constant 0 : i32
    %c0_i32_0 = arith.constant 0 : i32
    return %arg0, %arg2, %c0_i32 : i32, i32, i32
  }
  func.func @transform_2(%arg0: i32, %arg1: i32, %arg2: i32) -> (i32, i32, i32) {
    %c0_i32 = arith.constant 0 : i32
    %c0_i32_0 = arith.constant 0 : i32
    return %arg0, %arg2, %c0_i32 : i32, i32, i32
  }
  func.func @transform_3(%arg0: i32, %arg1: i32, %arg2: i32) -> (i32, i32, i32) {
    %c0_i32 = arith.constant 0 : i32
    %c0_i32_0 = arith.constant 0 : i32
    return %arg0, %arg1, %c0_i32 : i32, i32, i32
  }
}

module attributes {stable_mosaic.version = 11 : i64} {
  func.func @_matmul_bias_kernel(%arg0: i32, %arg1: i32, %arg2: memref<16x32xf32, #tpu.memory_space<vmem>>, %arg3: memref<32x32xf32, #tpu.memory_space<vmem>>, %arg4: memref<1x32xf32, #tpu.memory_space<vmem>>, %arg5: memref<16x32xf32, #tpu.memory_space<vmem>>) attributes {dimension_semantics = [#tpu.dimension_semantics<parallel>, #tpu.dimension_semantics<parallel>], iteration_bounds = array<i64: 1, 1>, scalar_prefetch = 0 : i64, scratch_operands = 0 : i64, tpu.core_type = #tpu.core_type<tc>, window_params = [{transform_indices = @transform_0, window_bounds = array<i64: 16, 32>}, {transform_indices = @transform_1, window_bounds = array<i64: 32, 32>}, {transform_indices = @transform_2, window_bounds = array<i64: 1, 32>}, {transform_indices = @transform_3, window_bounds = array<i64: 16, 32>}]} {
    %c0 = arith.constant 0 : index
    %c0_0 = arith.constant 0 : index
    %0 = vector.load %arg2[%c0, %c0_0] : memref<16x32xf32, #tpu.memory_space<vmem>>, vector<16x32xf32>
    %c0_1 = arith.constant 0 : index
    %c0_2 = arith.constant 0 : index
    %1 = vector.load %arg3[%c0_1, %c0_2] : memref<32x32xf32, #tpu.memory_space<vmem>>, vector<32x32xf32>
    %cst = arith.constant dense<0.000000e+00> : vector<16x32xf32>
    %2 = tpu.matmul %0, %1, %cst {dimension_numbers = #tpu.dot_dimension_numbers<[1], [0], [0], [1], [0, 0, 1, 1], [], []>} : vector<16x32xf32>, vector<32x32xf32>, vector<16x32xf32> -> vector<16x32xf32>
    %c0_3 = arith.constant 0 : index
    %c0_4 = arith.constant 0 : index
    %3 = vector.load %arg4[%c0_3, %c0_4] : memref<1x32xf32, #tpu.memory_space<vmem>>, vector<1x32xf32>
    %4 = vector.broadcast %3 : vector<1x32xf32> to vector<16x32xf32>
    %5 = arith.addf %2, %4 : vector<16x32xf32>
    %c0_5 = arith.constant 0 : index
    %c0_6 = arith.constant 0 : index
    %6 = vector.load %arg5[%c0_5, %c0_6] : memref<16x32xf32, #tpu.memory_space<vmem>>, vector<16x32xf32>
    tpu.vector_store %arg5[%c0_5, %c0_6], %5 {strides = array<i32>} : memref<16x32xf32, #tpu.memory_space<vmem>>, vector<16x32xf32>,
    return
  }
  func.func @transform_0(%arg0: i32, %arg1: i32) -> (i32, i32) {
    %c0_i32 = arith.constant 0 : i32
    %c0_i32_0 = arith.constant 0 : i32
    return %arg0, %c0_i32 : i32, i32
  }
  func.func @transform_1(%arg0: i32, %arg1: i32) -> (i32, i32) {
    %c0_i32 = arith.constant 0 : i32
    %c0_i32_0 = arith.constant 0 : i32
    return %c0_i32, %arg1 : i32, i32
  }
  func.func @transform_2(%arg0: i32, %arg1: i32) -> (i32, i32) {
    %c0_i32 = arith.constant 0 : i32
    %c0_i32_0 = arith.constant 0 : i32
    return %c0_i32, %arg1 : i32, i32
  }
  func.func @transform_3(%arg0: i32, %arg1: i32) -> (i32, i32) {
    %c0_i32 = arith.constant 0 : i32
    return %arg0, %arg1 : i32, i32
  }
}

</mosaic_0001>

<bundles_post_ra>
// kernel: attention_forward.3
= control target key start
LH: loop header
LB: loop body
LE: loop exit
PB: predicated region body
PF: predicated region fallthrough
CT: control target
= control target key end

     0   :  { %7 = vsyncpa [#allocation3], 0  ;;  %s181_s0 = inlined_call_operand.hbm [shape: f32[16,32], index: 0, kind: input, shape index: {}]   ;;  %s182_s1 = inlined_call_operand.hbm [shape: f32[32,96], index: 1, kind: input, shape index: {}]   ;;  %s183_s2 = inlined_call_operand.vmem [shape: f32[16,96], index: 2, kind: output, shape index: {}]  }
   0x1   :  { %s13_s11 = sshll.u32 %s181_s0, 4  ;;  %s14_s11 = int_to_ptr.hbm [resolvable:$true] %s13_s11 }
   0x2   :  { %8 = vsyncpa [#allocation5], 0  ;;  %s150_s12 = smov [#allocation2]   ;;  %s26_s16 = sshll.u32 %s182_s1, 4  ;;  %s27_s16 = int_to_ptr.hbm [resolvable:$true] %s26_s16 }
   0x3   :  { %s15_s13 = sshll.u32 %s150_s12, 4  ;;  %s151_s17 = smov 128   ;;  %s16_s13 = int_to_ptr.vmem [resolvable:$true] %s15_s13 }
   0x4   :  { %s152_s18 = smov 8   ;;  %s153_s19 = smov [#allocation4]  }
   0x5   :  { %21 = dma.hbm_to_vmem [thread:$0]  %s14_s11, 256, %s16_s13, [#allocation3], %s151_s17, %s151_s17, %s152_s18  }
   0x6   :  { %s28_s20 = sshll.u32 %s153_s19, 4  ;;  %s29_s20 = int_to_ptr.vmem [resolvable:$true] %s28_s20 }
   0x7   :  { %34 = dma.hbm_to_vmem [thread:$0]  %s27_s16, 512, %s29_s20, [#allocation5], %s151_s17, %s151_s17, %s152_s18  }
   0x8   :  { %146 = dma.done.wait [#allocation3], 256  }
   0x9   :  { %147 = vsyncadd [#allocation3], 4294967040 }
   0xa   :  { %148 = dma.done.wait [#allocation5], 512  }
   0xb   :  { %149 = vsyncadd [#allocation5], 4294966784  ;;  %v48_v0 = vld [vmem:[#allocation4 + $0x18] sm:$0xff]  ;;  %v47_v1 = vld [vmem:[#allocation4 + $0x10] sm:$0xff]  ;;  %vm49_vm0 = vcmask 261120   ;;  %vm79_vm1 = vcmask 785408  }
   0xc   :  { %68 = vmatpush.msra.mxu0 %v48_v0  ;;  %90 = vmatpush.msra.mxu1 %v48_v0  ;;  %v46_v2 = vld [vmem:[#allocation4 + $0x8] sm:$0xff]  ;;  %v45_v3 = vld [vmem:[#allocation4] sm:$0xff]  ;;  %v43_v4 = vld [vmem:[#allocation2] sm:$0xff] }
   0xd   :  { %v44_v5 = vld [vmem:[#allocation2 + $0x8] sm:$0xff] }
   0xe   :  { %69 = vmatpush.msra.mxu0 %v47_v1  ;;  %91 = vmatpush.msra.mxu1 %v47_v1 }
  0x10   :  { %70 = vmatpush.msra.mxu0 %v46_v2  ;;  %92 = vmatpush.msra.mxu1 %v46_v2 }
  0x12   :  { %71 = vmatpush.msra.mxu0 %v45_v3  ;;  %93 = vmatpush.msra.mxu1 %v45_v3 }
  0x13   :  { %88 = vmatmul.msk.f32.vlgmr.msra.gmra.mxu0 %vm49_vm0, %v43_v4  ;;  %89 = vmatmul.msk.f32.vlgmr.msra.gmra.mxu1 %vm49_vm0, %v44_v5 }
  0x90   :  { %v73_v6 = vpop.f32.mrf.mxu0  ;;  %v76_v7 = vpop.f32.mrf.mxu1 }
  0x91   :  { %80 = vst.msk [vmem:[%s183_s2] sm:$0xff] %vm79_vm1, %v73_v6 }
  0x92   :  { %81 = vst.msk [vmem:[%s183_s2 + $0x8] sm:$0xff] %vm79_vm1, %v76_v7 }
  0x93   :  { %86 = vsyncpa [#allocation3], 1 }
  0x94   :  { %87 = vsyncpa [#allocation5], 1 }

// kernel: attention_forward.4
= control target key start
LH: loop header
LB: loop body
LE: loop exit
PB: predicated region body
PF: predicated region fallthrough
CT: control target
= control target key end

     0   :  { %s590_s12 = smov 0   ;;  %s592_s13 = smov 0   ;;  %s648_s0 = inlined_call_operand.vmem [shape: f32[16,8,4], index: 0, kind: input, shape index: {}]   ;;  %s649_s1 = inlined_call_operand.vmem [shape: f32[16,8,4], index: 1, kind: input, shape index: {}]   ;;  %s650_s2 = inlined_call_operand.vmem [shape: f32[16,8,4], index: 2, kind: input, shape index: {}]   ;;  %s651_s3 = inlined_call_operand.vmem [shape: f32[16,8,4], index: 3, kind: output, shape index: {}]  }
   0x1   :  { %s594_s14 = smov 0  }
   0x2 LB: > { %s32_s15 = sadd.s32 1, %s561_s13  ;;  %p497_p0 = scmp.ge.s32.totalorder %s565_s14, 1  ;;  %s565_s14 = sphi %s594_s14, %s13_s14   ;;  %s561_s13 = sphi %s592_s13, %s653_s13   ;;  %s557_s12 = sphi %s590_s12, %s652_s12  }
   0x3   : > { %p34_p1 = scmp.ge.s32.totalorder %s32_s15, 16  ;;  %p190_p2 = scmp.lt.s32.totalorder %s565_s14, 17 }
   0x5   : > { %s655_s15 = smov (%p34_p1, %s32_s15), 0  ;;  %p191_p3 = pnand %p497_p0, %p190_p2 }
   0x6   : > { %p232_p4 = scmp.lt.s32.totalorder (!%p191_p3), %s557_s12, 15 }
   0x7   : > { %194 = sbr.rel (%p191_p3) target bundleno = 659 (0x293), region = 32 }
   0xc   : > { %vm266_vm0 = vcmask 31744   ;;  %v567_v0 = vmov 0.0   ;;  %s657_s12 = smov (!%p232_p4, %s557_s12), 15  ;;  %vm268_vm1 = vcmask 7168   ;;  %v568_v5 = vmov -inf  }
   0xd   : > { %271 = vst.msk [vmem:[#allocation5] sm:$0xff] %vm266_vm0, %v567_v0  ;;  %s609_s16 = sshll.u32 %s657_s12, 3  ;;  %vm302_vm2 = vcmask 64512   ;;  %v569_v8 = vmov 0  }
   0xe   : > { %s238_s19 = scalar_lea.vmem %s648_s0, %s609_s16  ;;  %s245_s22 = scalar_lea.vmem %s649_s1, %s609_s16  ;;  %269 = vst.msk [vmem:[#allocation3] sm:$0xff] %vm268_vm1, %v568_v5  ;;  %534 = vset.pattern.permute.xlu0 %v569_v8  ;;  %536 = vset.pattern.permute.xlu2 %v569_v8 }
   0xf   : > { %v264_v1 = vld [vmem:[%s238_s19] sm:$0xff]  ;;  %270 = vst.msk [vmem:[#allocation4] sm:$0xff] %vm268_vm1, %v567_v0  ;;  %535 = vset.pattern.permute.xlu1 %v569_v8  ;;  %s252_s25 = scalar_lea.vmem %s650_s2, %s609_s16  ;;  %s259_s28 = scalar_lea.vmem %s651_s3, %s609_s16 }
  0x10   : > { %v273_v2 = vld [vmem:[%s245_s22] sm:$0xff]  ;;  %v265_v3 = vmul.f32 0.5, %v264_v1 }
  0x11   : > { %502 = vmatpush.xpose.msk.msra.mxu0 %vm266_vm0, %v273_v2  ;;  %v333_v15 = vld [vmem:[%s252_s25] sm:$0xff] }
  0x12   : > { %267 = vst.msk [vmem:[#allocation2] sm:$0xff] %vm266_vm0, %v265_v3  ;;  %352 = vmatpush.msra.mxu1 %v333_v15 }
  0x14   : > { %v326_v25 = vld [vmem:[#allocation5] sm:$0xff] }
  0x15   : > { %v301_v9 = vld [vmem:[#allocation3] sm:$0xff] }
  0x16   : > { %v318_v21 = vld [vmem:[#allocation4] sm:$0xff] }
  0x19   : > { %v272_v4 = vld [vmem:[#allocation2] sm:$0xff] }
  0x1a   : > { %503 = vmatmul.msk.f32.vlgmr.msra.gmra.mxu0 %vm266_vm0, %v272_v4 }
  0x97   : > { %v298_v6 = vpop.f32.mrf.mxu0 }
  0x98   : > { %v303_v7 = vsel %vm302_vm2, %v298_v6, -inf }
  0x99   : > { %304 = vmax.xlane.f32.xlu0 %v303_v7 }
 0x10c   : > { %v305_v10 = vpop.xlane.xlu0 %304 }
 0x10d   : > { %v306_v11 = vmax.f32 %v301_v9, %v305_v10 }
 0x10f   : > { %v307_v12 = vsub.f32 %v301_v9, %v306_v11  ;;  %359 = vst.msk [vmem:[#allocation3] sm:$0xff] %vm268_vm1, %v306_v11  ;;  %312 = vperm.xlu0 %534, %v306_v11  }
 0x111   : > { %v308_v13 = vmul.f32 1.442695, %v307_v12 }
 0x113   : > { %537 = vpow2.f32 %v308_v13 }
 0x119   : > { %v538_v14 = vpop.eup %537 }
 0x11a   : > { %329 = vperm.xlu2 %536, %v538_v14   ;;  %v319_v22 = vmul.f32 %v538_v14, %v318_v21 }
 0x174   : > { %v330_v26 = vpop.permute.xlu2 %329 }
 0x175   : > { %v332_v27 = vmul.f32 %v330_v26, %v326_v25 }
 0x181   : > { %v313_v16 = vpop.permute.xlu0 %312 }
 0x182   : > { %v315_v17 = vsub.f32 %v298_v6, %v313_v16 }
 0x184   : > { %v316_v18 = vmul.f32 1.442695, %v315_v17 }
 0x186   : > { %539 = vpow2.f32 %v316_v18 }
 0x18c   : > { %v540_v19 = vpop.eup %539 }
 0x18d   : > { %504 = vmatmul.msk.f32.vlgmr.msra.gmra.mxu1 %vm302_vm2, %v540_v19  ;;  %v320_v20 = vsel %vm302_vm2, %v540_v19, 0.0 }
 0x18e   : > { %321 = vadd.xlane.f32.xlu1 %v320_v20 }
 0x201   : > { %v322_v23 = vpop.xlane.xlu1 %321 }
 0x202   : > { %v323_v24 = vadd.f32 %v322_v23, %v319_v22 }
 0x204   : > { %325 = vst.msk [vmem:[#allocation4] sm:$0xff] %vm268_vm1, %v323_v24 }
 0x20a   : > { %v354_v28 = vpop.f32.mrf.mxu1 }
 0x20b   : > { %v357_v29 = vadd.f32 %v354_v28, %v332_v27  ;;  %v364_v30 = vld [vmem:[#allocation4] sm:$0xff] }
 0x20c   : > { %367 = vperm.xlu1 %535, %v364_v30  }
 0x20d   : > { %358 = vst.msk [vmem:[#allocation5] sm:$0xff] %vm266_vm0, %v357_v29 }
 0x214   : > { %v363_v41 = vld [vmem:[#allocation5] sm:$0xff] }
 0x27e   : > { %v368_v31 = vpop.permute.xlu1 %367 }
 0x27f   : > { %541 = vrcp.f32 %v368_v31  ;;  %v381_v35 = vand.u32 2147483648, %v368_v31  ;;  %v379_v37 = vand.u32 2147483647, %v368_v31  ;;  %vm375_vm4 = vweird.f32 %v368_v31 }
 0x281   : > { %v382_v39 = vor.u32 1.1754944e-38, %v381_v35  ;;  %vm380_vm6 = vcmp.eq.f32.partialorder %v379_v37, 8.507059e+37 }
 0x285   : > { %v542_v32 = vpop.eup %541 }
 0x286   : > { %v371_v33 = vmul.f32 %v542_v32, %v368_v31  ;;  %vm376_vm3 = vweird.f32 %v542_v32 }
 0x287   : > { %vm377_vm5 = vmor %vm375_vm4, %vm376_vm3 }
 0x288   : > { %v372_v34 = vsub.f32 1.0, %v371_v33 }
 0x28a   : > { %v373_v36 = vmul.f32 %v542_v32, %v372_v34 }
 0x28c   : > { %v374_v38 = vadd.f32 %v542_v32, %v373_v36 }
 0x28e   : > { %v378_v40 = vsel %vm377_vm5, %v542_v32, %v374_v38 }
 0x28f   : > { %v383_v42 = vsel %vm380_vm6, %v382_v39, %v378_v40 }
 0x290   : > { %v384_v43 = vmul.f32 %v383_v42, %v363_v41 }
 0x292   : > { %385 = vst.msk [vmem:[%s259_s28] sm:$0xff] %vm266_vm0, %v384_v43 }
 0x293 PF: > { %s13_s14 = sadd.s32 1, %s565_s14   ;;  %s652_s12 = smov %s561_s13 }
 0x294   : > { %p10_p5 = scmp.ge.s32.totalorder %s13_s14, 18   ;;  %s653_s13 = smov %s655_s15 }
 0x296   :  { %12 = sbr.rel (!%p10_p5) target bundleno = 2 (0x2), region = 76 }

// kernel: attention_forward.5
= control target key start
LH: loop header
LB: loop body
LE: loop exit
PB: predicated region body
PF: predicated region fallthrough
CT: control target
= control target key end

     0   :  { %s162_s0 = inlined_call_operand.vmem [shape: f32[16,32], index: 0, kind: input, shape index: {}]   ;;  %s163_s1 = inlined_call_operand.vmem [shape: f32[32,32], index: 1, kind: input, shape index: {}]   ;;  %s164_s2 = inlined_call_operand.vmem [shape: f32[1,32], index: 2, kind: input, shape index: {}]   ;;  %s165_s3 = inlined_call_operand.hbm [shape: f32[16,32], index: 3, kind: output, shape index: {}]  }
   0x1   :  { %v20_v0 = vld [vmem:[%s163_s1 + $0x18] sm:$0xff]  ;;  %v19_v1 = vld [vmem:[%s163_s1 + $0x10] sm:$0xff]  ;;  %v18_v2 = vld [vmem:[%s163_s1 + $0x8] sm:$0xff] }
   0x2   :  { %44 = vmatpush.msra.mxu0 %v20_v0  ;;  %77 = vmatpush.msra.mxu1 %v20_v0 }
   0x3   :  { %8 = vsyncpa [#allocation3], 0  ;;  %v17_v3 = vld [vmem:[%s163_s1] sm:$0xff]  ;;  %vm25_vm0 = vcmask 261120   ;;  %v16_v5 = vld [vmem:[%s162_s0 + $0x8] sm:$0xff]  ;;  %s111_s1 = smov [#allocation2]  }
   0x4   :  { %45 = vmatpush.msra.mxu0 %v19_v1  ;;  %78 = vmatpush.msra.mxu1 %v19_v1  ;;  %v15_v4 = vld [vmem:[%s162_s0] sm:$0xff]  ;;  %s61_s26 = sshll.u32 %s111_s1, 4  ;;  %s63_s29 = sshll.u32 %s165_s3, 4  ;;  %s62_s26 = int_to_ptr.vmem [resolvable:$true] %s61_s26  ;;  %s64_s29 = int_to_ptr.hbm [resolvable:$true] %s63_s29 }
   0x5   :  { %v84_v6 = vld [vmem:[%s164_s2] ss:$0 sm:$0xff]  ;;  %s112_s0 = smov 128   ;;  %s113_s30 = smov 8  }
   0x6   :  { %46 = vmatpush.msra.mxu0 %v18_v2  ;;  %79 = vmatpush.msra.mxu1 %v18_v2 }
   0x8   :  { %47 = vmatpush.msra.mxu0 %v17_v3  ;;  %80 = vmatpush.msra.mxu1 %v17_v3 }
   0x9   :  { %75 = vmatmul.msk.f32.vlgmr.msra.gmra.mxu0 %vm25_vm0, %v15_v4  ;;  %76 = vmatmul.msk.f32.vlgmr.msra.gmra.mxu1 %vm25_vm0, %v16_v5 }
  0x86   :  { %v49_v7 = vpop.f32.mrf.mxu0  ;;  %v52_v8 = vpop.f32.mrf.mxu1 }
  0x87   :  { %v50_v9 = vadd.f32 %v84_v6, %v49_v7  ;;  %v53_v10 = vadd.f32 %v84_v6, %v52_v8 }
  0x89   :  { %55 = vst.msk [vmem:[#allocation2] sm:$0xff] %vm25_vm0, %v50_v9 }
  0x8a   :  { %56 = vst.msk [vmem:[#allocation2 + $0x8] sm:$0xff] %vm25_vm0, %v53_v10 }
  0x8b   :  { %69 = dma.vmem_to_hbm [thread:$0]  %s62_s26, 256, %s64_s29, [#allocation3], %s112_s0, %s112_s0, %s113_s30  }
  0x8c   :  { %109 = dma.done.wait [#allocation3], 256  }
  0x8d   :  { %110 = vsyncadd [#allocation3], 4294967040 }
  0x8e   :  { %74 = vsyncpa [#allocation3], 1 }

</bundles_post_ra>
